<compile_context>
chip_gen: v7x
topology: tpu7x:2x2x1
jax: 0.10.0
libtpu: 0.0.40
codegen_flags: <defaults>
</compile_context>

<pallas_src>
import jax
import jax.numpy as jnp
from jax.experimental import pallas as pl
from jax.experimental.pallas import tpu as pltpu


_NEG_BIG = float(jnp.finfo(jnp.float32).min)


def _make_soft_ce_kernel(num_classes, mask_last_chunk):
    """Kernel factory; num_classes / mask_last_chunk are static."""

    def kernel(x_ref, t_ref, loss_ref, m_sc, l_sc, st_sc, stx_sc):
        kc = pl.program_id(1)

        @pl.when(kc == 0)
        def _():
            m_sc[...] = jnp.full_like(m_sc, _NEG_BIG)
            l_sc[...] = jnp.zeros_like(l_sc)
            st_sc[...] = jnp.zeros_like(st_sc)
            stx_sc[...] = jnp.zeros_like(stx_sc)

        x = x_ref[...].astype(jnp.float32)          # (TM, TC)
        t = t_ref[...].astype(jnp.float32)          # (TM, TC)

        if mask_last_chunk:
            # Only emitted when C % class_chunk != 0: mask lanes past C in the
            # final class chunk (logits -> huge negative, targets -> 0).
            tm, tc = x_ref.shape
            col = kc * tc + jax.lax.broadcasted_iota(jnp.int32, (tm, tc), 1)
            valid = col < num_classes
            x = jnp.where(valid, x, _NEG_BIG)
            t = jnp.where(valid, t, 0.0)

        # Online logsumexp over class chunks + running sums for the algebraic
        # form:   loss = (m + log(l)) * sum(t) - sum(t * x)
        m_prev = m_sc[...]                                             # (TM, 1)
        m_new = jnp.maximum(m_prev, jnp.max(x, axis=-1, keepdims=True))
        alpha = jnp.exp(m_prev - m_new)
        l_sc[...] = alpha * l_sc[...] + jnp.sum(jnp.exp(x - m_new),
                                                axis=-1, keepdims=True)
        st_sc[...] = st_sc[...] + jnp.sum(t, axis=-1, keepdims=True)
        stx_sc[...] = stx_sc[...] + jnp.sum(t * x, axis=-1, keepdims=True)
        m_sc[...] = m_new

        @pl.when(kc == pl.num_programs(1) - 1)
        def _():
            lse = m_sc[...] + jnp.log(l_sc[...])
            loss_ref[...] = lse * st_sc[...] - stx_sc[...]

    return kernel


def _per_row_vmem_bytes(tc, x_itemsize, t_itemsize):
    """Pipelined VMEM bytes per row of the tile (conservative)."""
    # 2 pipeline buffers per input block + ~5 (TM, TC) f32 temporaries of the
    # fused upcast/exp/weighted-sum chain + the four (TM, 1) f32 accumulators.
    return 2 * tc * (x_itemsize + t_itemsize) + 5 * tc * 4 + 4 * 4


def _pick_tile_rows(n, tc, x_itemsize, t_itemsize, vmem_cap):
    """Row-tile size: byte-targeted DMA blocks under a VMEM footprint bound."""
    per_row = _per_row_vmem_bytes(tc, x_itemsize, t_itemsize)

    # Hard bound: budget ~50% of physical VMEM for the modeled footprint
    # (leaves headroom for Mosaic scratch, output buffers, alignment).
    tm_vmem = max(8, int(0.5 * vmem_cap) // per_row)

    # Byte-targeted block: ~4 MiB per input block amortizes the fixed
    # per-grid-step overhead (measured roofline saturates around 1-4 MiB).
    tm_bytes = max(8, (4 << 20) // max(1, tc * max(x_itemsize, t_itemsize, 4)))

    tm = min(tm_vmem, tm_bytes)

    # Keep several grid steps for non-trivial N so the DMA pipeline and (on
    # v7x) the second TensorCore actually engage.  Harmless on 1-TC chips.
    if n > 1024:
        tm = min(tm, pl.cdiv(n, 8))
    elif n > 128:
        tm = min(tm, pl.cdiv(n, 2))

    tm = min(tm, n)
    if tm < n:
        tm = max(8, (tm // 8) * 8)      # sublane multiple; round DOWN
    return tm


def soft_target_cross_entropy(x, target, *, row_tile=None, class_chunk=None):
    """x, target: (N, C). Returns scalar f32 mean soft cross entropy."""
    n, c = x.shape
    assert target.shape == (n, c)

    # ---- class-axis chunking (large-C path) ---------------------------------
    if class_chunk is None:
        class_chunk = c if c <= 8192 else 2048
    if class_chunk >= c:
        tc, n_ct = c, 1                              # single full-extent block
    else:
        tc = max(128, (class_chunk // 128) * 128)    # 128-lane aligned chunks
        if tc >= c:
            tc, n_ct = c, 1
        else:
            n_ct = pl.cdiv(c, tc)
    mask_last = (n_ct > 1) and (c % tc != 0)

    # ---- row-axis tiling -----------------------------------------------------
    try:
        vmem_cap = int(pltpu.get_tpu_info().vmem_capacity_bytes)
    except Exception:
        vmem_cap = 64 * 1024 * 1024                  # conservative: v7x per-TC

    x_b = jnp.dtype(x.dtype).itemsize
    t_b = jnp.dtype(target.dtype).itemsize

    if row_tile is None:
        tm = _pick_tile_rows(n, tc, x_b, t_b, vmem_cap)
    else:
        tm = min(int(row_tile), n)
        if tm < n:
            tm = max(8, (tm // 8) * 8)

    # Scoped VMEM limit: modeled footprint + headroom, never above ~90% of
    # physical VMEM (keeps v7x's 64 MiB per-TC budget safe; v5e default is 16 MiB).
    per_row = _per_row_vmem_bytes(tc, x_b, t_b)
    est_footprint = per_row * tm + 2 * tm * 4 + 4 * tm * 4
    vmem_limit = int(min(int(0.9 * vmem_cap),
                         max(est_footprint + (8 << 20), 32 << 20)))

    grid = (pl.cdiv(n, tm), n_ct)
    kernel = _make_soft_ce_kernel(c, mask_last)

    per_row_loss = pl.pallas_call(
        kernel,
        out_shape=jax.ShapeDtypeStruct((n, 1), jnp.float32),
        grid_spec=pltpu.PrefetchScalarGridSpec(
            num_scalar_prefetch=0,
            grid=grid,
            in_specs=[
                pl.BlockSpec((tm, tc), lambda i, k: (i, k)),
                pl.BlockSpec((tm, tc), lambda i, k: (i, k)),
            ],
            out_specs=pl.BlockSpec((tm, 1), lambda i, k: (i, 0)),
            scratch_shapes=[pltpu.VMEM((tm, 1), jnp.float32)] * 4,
        ),
        compiler_params=pltpu.CompilerParams(
            dimension_semantics=("parallel", "arbitrary"),
            vmem_limit_bytes=vmem_limit,
        ),
    )(x, target)

    return jnp.mean(per_row_loss)


def _reference(x, target):
    x = x.astype(jnp.float32)
    target = target.astype(jnp.float32)
    log_probs = jax.nn.log_softmax(x, axis=-1)
    return jnp.mean(jnp.sum(-target * log_probs, axis=-1))


if __name__ == "__main__":
    key = jax.random.PRNGKey(0)

    def run_case(n, c, **kw):
        kx, kt = jax.random.split(jax.random.fold_in(key, n * 100003 + c))
        xx = jax.random.normal(kx, (n, c), dtype=jnp.float32)
        # soft targets: a probability distribution per row
        tt = jax.nn.softmax(jax.random.normal(kt, (n, c), dtype=jnp.float32), axis=-1)
        loss = soft_target_cross_entropy(xx, tt, **kw)
        jax.block_until_ready(loss)
        ref = _reference(xx, tt)
        assert jnp.allclose(loss, ref, rtol=1e-4, atol=1e-5), (n, c, kw, loss, ref)
        return loss

    # Small (batch, num_classes) shapes consistent with the module.
    run_case(8, 128)                                   # single-block fast path
    run_case(16, 384, row_tile=8, class_chunk=128)     # row tiles + class chunks
    run_case(12, 200, row_tile=8, class_chunk=128)     # partial row & masked class tile
    print("KERNEL_OK")
</pallas_src>

<mosaic_0001>
module attributes {stable_mosaic.version = 11 : i64} {
  func.func @kernel(%arg0: i32, %arg1: i32, %arg2: memref<8x128xf32, #tpu.memory_space<vmem>>, %arg3: memref<8x128xf32, #tpu.memory_space<vmem>>, %arg4: memref<8x1xf32, #tpu.memory_space<vmem>>, %arg5: memref<8x1xf32, #tpu.memory_space<vmem>>, %arg6: memref<8x1xf32, #tpu.memory_space<vmem>>, %arg7: memref<8x1xf32, #tpu.memory_space<vmem>>, %arg8: memref<8x1xf32, #tpu.memory_space<vmem>>) attributes {dimension_semantics = [#tpu.dimension_semantics<parallel>, #tpu.dimension_semantics<arbitrary>], iteration_bounds = array<i64: 1, 1>, scalar_prefetch = 0 : i64, scratch_operands = 4 : i64, tpu.core_type = #tpu.core_type<tc>, window_params = [{transform_indices = @transform_0, window_bounds = array<i64: 8, 128>}, {transform_indices = @transform_1, window_bounds = array<i64: 8, 128>}, {transform_indices = @transform_2, window_bounds = array<i64: 8, 1>}]} {
    %c0_i32 = arith.constant 0 : i32
    %0 = arith.cmpi eq, %arg1, %c0_i32 : i32
    %1 = arith.extui %0 : i1 to i32
    %c0_i32_0 = arith.constant 0 : i32
    %2 = arith.cmpi ne, %1, %c0_i32_0 : i32
    scf.if %2 {
      %cst_25 = arith.constant -3.40282347E+38 : f32
      %35 = vector.broadcast %cst_25 : f32 to vector<8x1xf32>
      %c0_26 = arith.constant 0 : index
      %c0_27 = arith.constant 0 : index
      %36 = vector.load %arg5[%c0_26, %c0_27] : memref<8x1xf32, #tpu.memory_space<vmem>>, vector<8x1xf32>
      tpu.vector_store %arg5[%c0_26, %c0_27], %35 {strides = array<i32>} : memref<8x1xf32, #tpu.memory_space<vmem>>, vector<8x1xf32>,
      %cst_28 = arith.constant 0.000000e+00 : f32
      %37 = vector.broadcast %cst_28 : f32 to vector<8x1xf32>
      %c0_29 = arith.constant 0 : index
      %c0_30 = arith.constant 0 : index
      %38 = vector.load %arg6[%c0_29, %c0_30] : memref<8x1xf32, #tpu.memory_space<vmem>>, vector<8x1xf32>
      tpu.vector_store %arg6[%c0_29, %c0_30], %37 {strides = array<i32>} : memref<8x1xf32, #tpu.memory_space<vmem>>, vector<8x1xf32>,
      %cst_31 = arith.constant 0.000000e+00 : f32
      %39 = vector.broadcast %cst_31 : f32 to vector<8x1xf32>
      %c0_32 = arith.constant 0 : index
      %c0_33 = arith.constant 0 : index
      %40 = vector.load %arg7[%c0_32, %c0_33] : memref<8x1xf32, #tpu.memory_space<vmem>>, vector<8x1xf32>
      tpu.vector_store %arg7[%c0_32, %c0_33], %39 {strides = array<i32>} : memref<8x1xf32, #tpu.memory_space<vmem>>, vector<8x1xf32>,
      %cst_34 = arith.constant 0.000000e+00 : f32
      %41 = vector.broadcast %cst_34 : f32 to vector<8x1xf32>
      %c0_35 = arith.constant 0 : index
      %c0_36 = arith.constant 0 : index
      %42 = vector.load %arg8[%c0_35, %c0_36] : memref<8x1xf32, #tpu.memory_space<vmem>>, vector<8x1xf32>
      tpu.vector_store %arg8[%c0_35, %c0_36], %41 {strides = array<i32>} : memref<8x1xf32, #tpu.memory_space<vmem>>, vector<8x1xf32>,
    } else {
    }
    %c0 = arith.constant 0 : index
    %c0_1 = arith.constant 0 : index
    %3 = vector.load %arg2[%c0, %c0_1] : memref<8x128xf32, #tpu.memory_space<vmem>>, vector<8x128xf32>
    %c0_2 = arith.constant 0 : index
    %c0_3 = arith.constant 0 : index
    %4 = vector.load %arg3[%c0_2, %c0_3] : memref<8x128xf32, #tpu.memory_space<vmem>>, vector<8x128xf32>
    %c0_4 = arith.constant 0 : index
    %c0_5 = arith.constant 0 : index
    %5 = vector.load %arg5[%c0_4, %c0_5] : memref<8x1xf32, #tpu.memory_space<vmem>>, vector<8x1xf32>
    %cst = arith.constant dense<0xFF800000> : vector<8xf32>
    %6 = vector.multi_reduction <maximumf>, %3, %cst [1] : vector<8x128xf32> to vector<8xf32>
    %7 = vector.shape_cast %6 : vector<8xf32> to vector<8x1xf32>
    %8 = arith.maximumf %5, %7 : vector<8x1xf32>
    %9 = arith.subf %5, %8 : vector<8x1xf32>
    %10 = math.exp %9 : vector<8x1xf32>
    %c0_6 = arith.constant 0 : index
    %c0_7 = arith.constant 0 : index
    %11 = vector.load %arg6[%c0_6, %c0_7] : memref<8x1xf32, #tpu.memory_space<vmem>>, vector<8x1xf32>
    %12 = arith.mulf %10, %11 : vector<8x1xf32>
    %13 = vector.broadcast %8 : vector<8x1xf32> to vector<8x128xf32>
    %14 = arith.subf %3, %13 : vector<8x128xf32>
    %15 = math.exp %14 : vector<8x128xf32>
    %cst_8 = arith.constant dense<0.000000e+00> : vector<8xf32>
    %16 = vector.multi_reduction <add>, %15, %cst_8 [1] : vector<8x128xf32> to vector<8xf32>
    %17 = vector.shape_cast %16 : vector<8xf32> to vector<8x1xf32>
    %18 = arith.addf %12, %17 : vector<8x1xf32>
    %c0_9 = arith.constant 0 : index
    %c0_10 = arith.constant 0 : index
    %19 = vector.load %arg6[%c0_9, %c0_10] : memref<8x1xf32, #tpu.memory_space<vmem>>, vector<8x1xf32>
    tpu.vector_store %arg6[%c0_9, %c0_10], %18 {strides = array<i32>} : memref<8x1xf32, #tpu.memory_space<vmem>>, vector<8x1xf32>,
    %c0_11 = arith.constant 0 : index
    %c0_12 = arith.constant 0 : index
    %20 = vector.load %arg7[%c0_11, %c0_12] : memref<8x1xf32, #tpu.memory_space<vmem>>, vector<8x1xf32>
    %cst_13 = arith.constant dense<0.000000e+00> : vector<8xf32>
    %21 = vector.multi_reduction <add>, %4, %cst_13 [1] : vector<8x128xf32> to vector<8xf32>
    %22 = vector.shape_cast %21 : vector<8xf32> to vector<8x1xf32>
    %23 = arith.addf %20, %22 : vector<8x1xf32>
    %c0_14 = arith.constant 0 : index
    %c0_15 = arith.constant 0 : index
    %24 = vector.load %arg7[%c0_14, %c0_15] : memref<8x1xf32, #tpu.memory_space<vmem>>, vector<8x1xf32>
    tpu.vector_store %arg7[%c0_14, %c0_15], %23 {strides = array<i32>} : memref<8x1xf32, #tpu.memory_space<vmem>>, vector<8x1xf32>,
    %c0_16 = arith.constant 0 : index
    %c0_17 = arith.constant 0 : index
    %25 = vector.load %arg8[%c0_16, %c0_17] : memref<8x1xf32, #tpu.memory_space<vmem>>, vector<8x1xf32>
    %26 = arith.mulf %4, %3 : vector<8x128xf32>
    %cst_18 = arith.constant dense<0.000000e+00> : vector<8xf32>
    %27 = vector.multi_reduction <add>, %26, %cst_18 [1] : vector<8x128xf32> to vector<8xf32>
    %28 = vector.shape_cast %27 : vector<8xf32> to vector<8x1xf32>
    %29 = arith.addf %25, %28 : vector<8x1xf32>
    %c0_19 = arith.constant 0 : index
    %c0_20 = arith.constant 0 : index
    %30 = vector.load %arg8[%c0_19, %c0_20] : memref<8x1xf32, #tpu.memory_space<vmem>>, vector<8x1xf32>
    tpu.vector_store %arg8[%c0_19, %c0_20], %29 {strides = array<i32>} : memref<8x1xf32, #tpu.memory_space<vmem>>, vector<8x1xf32>,
    %c0_21 = arith.constant 0 : index
    %c0_22 = arith.constant 0 : index
    %31 = vector.load %arg5[%c0_21, %c0_22] : memref<8x1xf32, #tpu.memory_space<vmem>>, vector<8x1xf32>
    tpu.vector_store %arg5[%c0_21, %c0_22], %8 {strides = array<i32>} : memref<8x1xf32, #tpu.memory_space<vmem>>, vector<8x1xf32>,
    %c0_i32_23 = arith.constant 0 : i32
    %32 = arith.cmpi eq, %arg1, %c0_i32_23 : i32
    %33 = arith.extui %32 : i1 to i32
    %c0_i32_24 = arith.constant 0 : i32
    %34 = arith.cmpi ne, %33, %c0_i32_24 : i32
    scf.if %34 {
      %c0_25 = arith.constant 0 : index
      %c0_26 = arith.constant 0 : index
      %35 = vector.load %arg5[%c0_25, %c0_26] : memref<8x1xf32, #tpu.memory_space<vmem>>, vector<8x1xf32>
      %c0_27 = arith.constant 0 : index
      %c0_28 = arith.constant 0 : index
      %36 = vector.load %arg6[%c0_27, %c0_28] : memref<8x1xf32, #tpu.memory_space<vmem>>, vector<8x1xf32>
      %37 = math.log %36 : vector<8x1xf32>
      %38 = arith.addf %35, %37 : vector<8x1xf32>
      %c0_29 = arith.constant 0 : index
      %c0_30 = arith.constant 0 : index
      %39 = vector.load %arg7[%c0_29, %c0_30] : memref<8x1xf32, #tpu.memory_space<vmem>>, vector<8x1xf32>
      %40 = arith.mulf %38, %39 : vector<8x1xf32>
      %c0_31 = arith.constant 0 : index
      %c0_32 = arith.constant 0 : index
      %41 = vector.load %arg8[%c0_31, %c0_32] : memref<8x1xf32, #tpu.memory_space<vmem>>, vector<8x1xf32>
      %42 = arith.subf %40, %41 : vector<8x1xf32>
      %c0_33 = arith.constant 0 : index
      %c0_34 = arith.constant 0 : index
      %43 = vector.load %arg4[%c0_33, %c0_34] : memref<8x1xf32, #tpu.memory_space<vmem>>, vector<8x1xf32>
      tpu.vector_store %arg4[%c0_33, %c0_34], %42 {strides = array<i32>} : memref<8x1xf32, #tpu.memory_space<vmem>>, vector<8x1xf32>,
    } else {
    }
    return
  }
  func.func @transform_0(%arg0: i32, %arg1: i32) -> (i32, i32) {
    %c0_i32 = arith.constant 0 : i32
    return %arg0, %arg1 : i32, i32
  }
  func.func @transform_1(%arg0: i32, %arg1: i32) -> (i32, i32) {
    %c0_i32 = arith.constant 0 : i32
    return %arg0, %arg1 : i32, i32
  }
  func.func @transform_2(%arg0: i32, %arg1: i32) -> (i32, i32) {
    %c0_i32 = arith.constant 0 : i32
    %c0_i32_0 = arith.constant 0 : i32
    return %arg0, %c0_i32 : i32, i32
  }
}

</mosaic_0001>

<bundles_post_ra>
// kernel: tpu_custom_call.1
= control target key start
LH: loop header
LB: loop body
LE: loop exit
PB: predicated region body
PF: predicated region fallthrough
CT: control target
= control target key end

     0   :  { %7 = vsyncpa [#allocation7], 0  ;;  %s215_s0 = inlined_call_operand.hbm [shape: f32[8,128], index: 0, kind: input, shape index: {}]   ;;  %s216_s1 = inlined_call_operand.hbm [shape: f32[8,128], index: 1, kind: input, shape index: {}]   ;;  %s217_s2 = inlined_call_operand.vmem [shape: f32[8,1], index: 2, kind: output, shape index: {}]  }
   0x1   :  { %8 = vsyncpa [#allocation9], 0  ;;  %s159_s9 = smov [#allocation6]   ;;  %s160_s11 = smov [#allocation8]  }
   0x2   :  { %s15_s10 = sshll.u32 %s159_s9, 4  ;;  %s25_s12 = sshll.u32 %s160_s11, 4  ;;  %s16_s10 = int_to_ptr.vmem [resolvable:$true] %s15_s10  ;;  %s26_s12 = int_to_ptr.vmem [resolvable:$true] %s25_s12 }
   0x3   :  { %s111_s15 = scalar_lea.hbm %s215_s0, 128 }
   0x4   :  { %p112_p0 = scmp.ne.s32.totalorder %s215_s0, %s111_s15  ;;  %p115_p1 = scmp.lt.u32.totalorder %s111_s15, %s215_s0 }
   0x6   :  { %p117_p2 = pnand %p115_p1, %p112_p0 }
   0x8   :  { %120 = shalt.err (!%p117_p2)
}
   0x9   :  { %s121_s20 = scalar_lea.vmem %s16_s10, 128  ;;  %p126_p4 = scmp.lt.s32.totalorder %s16_s10, %s16_s10 }
   0xa   :  { %p122_p3 = scmp.ne.s32.totalorder %s16_s10, %s121_s20  ;;  %p127_p5 = scmp.lt.s32.totalorder %s121_s20, %s121_s20 }
   0xc   :  { %p128_p6 = por %p127_p5, %p126_p4 }
   0xe   :  { %p129_p7 = pnand %p128_p6, %p122_p3 }
  0x10   :  { %132 = shalt.err (!%p129_p7)
}
  0x11   :  { %18 = dma.hbm_to_vmem [thread:$0]  %s215_s0, 128, %s16_s10, [#allocation7]  }
  0x12   :  { %s133_s25 = scalar_lea.hbm %s216_s1, 128 }
  0x13   :  { %p134_p8 = scmp.ne.s32.totalorder %s216_s1, %s133_s25  ;;  %p137_p9 = scmp.lt.u32.totalorder %s133_s25, %s216_s1 }
  0x15   :  { %p139_p10 = pnand %p137_p9, %p134_p8 }
  0x17   :  { %142 = shalt.err (!%p139_p10)
}
  0x18   :  { %s143_s30 = scalar_lea.vmem %s26_s12, 128  ;;  %p148_p12 = scmp.lt.s32.totalorder %s26_s12, %s26_s12 }
  0x19   :  { %p144_p11 = scmp.ne.s32.totalorder %s26_s12, %s143_s30  ;;  %p149_p13 = scmp.lt.s32.totalorder %s143_s30, %s143_s30 }
  0x1b   :  { %p150_p0 = por %p149_p13, %p148_p12 }
  0x1d   :  { %p151_p1 = pnand %p150_p0, %p144_p11 }
  0x1f   :  { %154 = shalt.err (!%p151_p1)
}
  0x20   :  { %28 = dma.hbm_to_vmem [thread:$0]  %s216_s1, 128, %s26_s12, [#allocation9]  }
  0x21   :  { %155 = dma.done.wait [#allocation7], 128  }
  0x22   :  { %156 = vsyncadd [#allocation7], 4294967168 }
  0x23   :  { %157 = dma.done.wait [#allocation9], 128  }
  0x24   :  { %158 = vsyncadd [#allocation9], 4294967168  ;;  %vm39_vm0 = vcmask 7168   ;;  %v161_v0 = vmov -3.4028235e+38   ;;  %v44_v1 = vld [vmem:[#allocation6] sm:$0xff] }
  0x25   :  { %40 = vst.msk [vmem:[#allocation2] sm:$0xff] %vm39_vm0, %v161_v0  ;;  %47 = vmax.xlane.f32.xlu0 %v44_v1  ;;  %v162_v2 = vmov 0   ;;  %v163_v3 = vmov 0.0   ;;  %v45_v12 = vld [vmem:[#allocation8] sm:$0xff] }
  0x26   :  { %104 = vset.pattern.permute.xlu0 %v162_v2  ;;  %41 = vst.msk [vmem:[#allocation3] sm:$0xff] %vm39_vm0, %v163_v3  ;;  %42 = vst.msk [vmem:[#allocation4] sm:$0xff] %vm39_vm0, %v163_v3  ;;  %v74_v13 = vmul.f32 %v45_v12, %v44_v1 }
  0x27   :  { %43 = vst.msk [vmem:[#allocation5] sm:$0xff] %vm39_vm0, %v163_v3 }
  0x2c   :  { %v46_v4 = vld [vmem:[#allocation2] sm:$0xff] }
  0x2d   :  { %v53_v16 = vld [vmem:[#allocation3] sm:$0xff]  ;;  %v68_v20 = vld [vmem:[#allocation4] sm:$0xff] }
  0x2e   :  { %v73_v23 = vld [vmem:[#allocation5] sm:$0xff] }
  0xb2   :  { %v48_v5 = vpop.xlane.xlu0 %47 }
  0xb3   :  { %v49_v6 = vmax.f32 %v46_v4, %v48_v5 }
  0xb5   :  { %v50_v7 = vsub.f32 %v46_v4, %v49_v6  ;;  %79 = vst.msk [vmem:[#allocation2] sm:$0xff] %vm39_vm0, %v49_v6  ;;  %57 = vperm.xlu0 %104, %v49_v6  }
  0xb7   :  { %v51_v14 = vmul.f32 1.442695, %v50_v7 }
  0xbc   :  { %v83_v29 = vld [vmem:[#allocation2] sm:$0xff] }
 0x134   :  { %v58_v8 = vpop.permute.xlu0 %57 }
 0x135   :  { %v60_v9 = vsub.f32 %v44_v1, %v58_v8 }
 0x137   :  { %v61_v10 = vmul.f32 1.442695, %v60_v9 }
 0x139   :  { %105 = vpow2.f32 %v61_v10 }
 0x13a   :  { %107 = vpow2.f32 %v51_v14 }
 0x143   :  { %v106_v11 = vpop.eup %105 }
 0x144   :  { %63 = vadd.xlane.f32.xlu1 %v106_v11  ;;  %v108_v15 = vpop.eup %107 }
 0x145   :  { %v54_v17 = vmul.f32 %v108_v15, %v53_v16 }
 0x148   :  { %69 = vadd.xlane.f32.xlu1 %v45_v12 }
 0x14c   :  { %75 = vadd.xlane.f32.xlu1 %v74_v13 }
 0x1d1   :  { %v64_v18 = vpop.xlane.xlu1 %63 }
 0x1d2   :  { %v65_v19 = vadd.f32 %v64_v18, %v54_v17 }
 0x1d4   :  { %67 = vst.msk [vmem:[#allocation3] sm:$0xff] %vm39_vm0, %v65_v19 }
 0x1d5   :  { %v70_v21 = vpop.xlane.xlu1 %69 }
 0x1d6   :  { %v71_v22 = vadd.f32 %v70_v21, %v68_v20 }
 0x1d8   :  { %72 = vst.msk [vmem:[#allocation4] sm:$0xff] %vm39_vm0, %v71_v22 }
 0x1d9   :  { %v76_v24 = vpop.xlane.xlu1 %75 }
 0x1da   :  { %v77_v25 = vadd.f32 %v76_v24, %v73_v23 }
 0x1db   :  { %v84_v26 = vld [vmem:[#allocation3] sm:$0xff] }
 0x1dc   :  { %109 = vlog2.f32 %v84_v26  ;;  %78 = vst.msk [vmem:[#allocation5] sm:$0xff] %vm39_vm0, %v77_v25 }
 0x1df   :  { %v88_v31 = vld [vmem:[#allocation4] sm:$0xff] }
 0x1e3   :  { %v90_v32 = vld [vmem:[#allocation5] sm:$0xff] }
 0x1e6   :  { %v110_v27 = vpop.eup %109 }
 0x1e7   :  { %v86_v28 = vmul.f32 0.6931472, %v110_v27 }
 0x1e9   :  { %v87_v30 = vadd.f32 %v86_v28, %v83_v29 }
 0x1eb   :  { %v89_v33 = vmul.f32 %v88_v31, %v87_v30 }
 0x1ed   :  { %v91_v34 = vsub.f32 %v89_v33, %v90_v32 }
 0x1ef   :  { %92 = vst.msk [vmem:[%s217_s2] sm:$0xff] %vm39_vm0, %v91_v34 }
 0x1f0   :  { %97 = vsyncpa [#allocation7], 1 }
 0x1f1   :  { %98 = vsyncpa [#allocation9], 1 }

</bundles_post_ra>
